<compile_context>
chip_gen: v5e
topology: v5e:2x2
jax: 0.10.0
libtpu: 0.0.40
codegen_flags: <defaults>
</compile_context>

<pallas_src>
import functools
import math

import jax
import jax.numpy as jnp
from jax.experimental import pallas as pl
from jax.experimental.pallas import tpu as pltpu

BN_EPS = 1e-5
_TARGET_BLOCK_BYTES = 2 << 20          # ~2 MiB x-block per grid step (>=512-wide-tile regime)
_VMEM_LIMIT_BYTES = 32 * 1024 * 1024   # > v5e 16 MiB scoped default, < v7x 64 MiB physical VMEM

_COMPILER_PARAMS = pltpu.CompilerParams(
    dimension_semantics=("parallel",),          # batch-block axis: megacore-shardable on v7x
    vmem_limit_bytes=_VMEM_LIMIT_BYTES,
)


# ------------------------------ in-kernel math helpers ------------------------------
def _erf(x):
    # Abramowitz & Stegun 7.1.26 rational approximation (max abs err ~1.5e-7); exp -> EUP.
    a1, a2, a3, a4, a5 = 0.254829592, -0.284496736, 1.421413741, -1.453152027, 1.061405429
    p = 0.3275911
    sgn = jnp.where(x >= 0.0, 1.0, -1.0)
    ax = jnp.abs(x)
    t = 1.0 / (1.0 + p * ax)
    y = 1.0 - ((((a5 * t + a4) * t + a3) * t + a2) * t + a1) * t * jnp.exp(-ax * ax)
    return sgn * y


def _gelu(x):  # exact (erf) GELU, like torch.nn.GELU()
    return 0.5 * x * (1.0 + _erf(x * 0.7071067811865476))


def _sigmoid(x):  # exact sigmoid (review item: no approx reciprocal -- off the critical path)
    return 1.0 / (1.0 + jnp.exp(-x))


def _se_gate(pooled, w1, w2, vrd, b2):
    """Batched squeeze chain on the MXU: pooled (TB, K) -> gate (TB, K_out).
    vrd rows: [bn1_scale, bn1_shift, dw_center_tap, bn2_scale, bn2_shift] (length rd each)."""
    a = jnp.dot(pooled, w1, preferred_element_type=jnp.float32,
                precision=jax.lax.Precision.HIGHEST)                 # conv1 (1x1 / k=1, no bias)
    a = a * vrd[0:1, :] + vrd[1:2, :]                                # bn1 (eval, folded)
    a = _gelu(a)
    a = a * vrd[2:3, :]                                              # depthwise conv == center tap
    a = a * vrd[3:4, :] + vrd[4:5, :]                                # bn2 (eval, folded)
    a = _gelu(a)
    y = jnp.dot(a, w2, preferred_element_type=jnp.float32,
                precision=jax.lax.Precision.HIGHEST) + b2            # conv2 (1x1 / k=1, + bias)
    return _sigmoid(y)


# ------------------------------ kernel: 4D (B, C, H, W) branch ------------------------------
def se2d_kernel(x_ref, w1_ref, w2_ref, vrd_ref, b2_ref, o_ref, *, inv_hw):
    """x_ref block: (TB, C, HWp) -- NCHW with spatial dims flattened on the lane axis
    (HWp = H*W padded to a multiple of 128; padded lanes are zero so the sum is exact).
    w1_ref: (C, rd), w2_ref: (rd, C), vrd_ref: (5, rd), b2_ref: (1, C)."""
    x = x_ref[...]                                       # (TB, C, HWp)
    pooled = jnp.sum(x, axis=2) * inv_hw                 # (TB, C)  AdaptiveAvgPool2d(1)
    gate = _se_gate(pooled, w1_ref[...], w2_ref[...], vrd_ref[...], b2_ref[...])   # (TB, C)
    o_ref[...] = x * gate[:, :, None]                    # per-channel gate over H*W lanes


# ------------------------------ kernel: 3D (B, N, C) branch ------------------------------
def se1d_kernel(x_ref, w1_ref, w2_ref, vrd_ref, b2_ref, o_ref, *, inv_n):
    """x_ref block: (TB, N/g, g*C) -- lane-dense regrouping of (TB, N, C), g = 128/gcd(C,128).
    w1_ref: (g*C, rd)   conv1_1d.weight.T replicated g x along rows
    w2_ref: (rd, g*C)   conv2_1d.weight.T replicated g x along columns
    vrd_ref:(5, rd),  b2_ref: (1, g*C) conv2_1d.bias replicated g x.
    The replication makes the in-kernel gate come out already tiled to g*C lanes, so both the
    pooling reduce and the final store stay relayout-free and lane-dense."""
    x = x_ref[...]                                       # (TB, N/g, g*C)
    pooled = jnp.sum(x, axis=1) * inv_n                  # (TB, g*C)  grouped per-channel mean over N
    gate = _se_gate(pooled, w1_ref[...], w2_ref[...], vrd_ref[...], b2_ref[...])   # (TB, g*C)
    o_ref[...] = x * gate[:, None, :]                    # gate broadcast over N (torch transposes cancel)


# ------------------------------ pallas_call wrappers ------------------------------
def _pick_tb(batch, row_bytes):
    """Batch rows per grid step: ~_TARGET_BLOCK_BYTES per block, >= 2 grid steps when possible
    (v7x has 2 TensorCores), and an exact divisor of batch (no edge masking)."""
    tb = max(1, min(batch, _TARGET_BLOCK_BYTES // max(row_bytes, 1)))
    if batch >= 2:
        tb = min(tb, max(1, batch // 2))
    while batch % tb:
        tb -= 1
    return tb


def _const_spec(arr):
    nd = arr.ndim
    return pl.BlockSpec(arr.shape, lambda i, _nd=nd: (0,) * _nd)


def _se_4d(x, p):
    b, c, h, w = x.shape
    hw = h * w
    hwp = -(-hw // 128) * 128                 # lane-dense last dim -> unmasked output stores
    x3 = x.reshape(b, c, hw)                  # contiguous view of NCHW
    if hwp != hw:
        # One extra HBM pass over x; only taken when H*W is not already a multiple of 128.
        x3 = jnp.pad(x3, ((0, 0), (0, 0), (0, hwp - hw)))
    rd = p['w1'].shape[1]
    tb = _pick_tb(b, c * hwp * 4)
    consts = (p['w1'], p['w2'], p['vrd'], p['b2'])
    cost = pl.CostEstimate(
        flops=int(2 * b * c * hwp + 4 * b * c * rd),
        transcendentals=int(b * (2 * rd + c)),
        bytes_accessed=int(2 * b * c * hwp * 4 + sum(4 * a.size for a in consts)),
    )
    out = pl.pallas_call(
        functools.partial(se2d_kernel, inv_hw=1.0 / hw),
        out_shape=jax.ShapeDtypeStruct((b, c, hwp), jnp.float32),
        grid=(b // tb,),
        in_specs=[pl.BlockSpec((tb, c, hwp), lambda i: (i, 0, 0))]
                 + [_const_spec(a) for a in consts],
        out_specs=pl.BlockSpec((tb, c, hwp), lambda i: (i, 0, 0)),
        compiler_params=_COMPILER_PARAMS,
        cost_estimate=cost,
    )(x3, *consts)
    if hwp != hw:
        out = out[:, :, :hw]
    return out.reshape(b, c, h, w)


def _se_3d(x, p):
    b, n, c = x.shape
    g = 128 // math.gcd(c, 128)               # smallest g with (g*c) % 128 == 0
    if n % g:
        g = 1                                 # fallback: only the last lane tile of a store is masked
    gc = g * c
    xg = x.reshape(b, n // g, gc)             # contiguous regroup -> lane-dense blocks (free)
    w1 = jnp.tile(p['w1'], (g, 1)) if g > 1 else p['w1']    # (g*C, rd)
    w2 = jnp.tile(p['w2'], (1, g)) if g > 1 else p['w2']    # (rd, g*C)
    b2 = jnp.tile(p['b2'], (1, g)) if g > 1 else p['b2']    # (1, g*C)
    rd = p['w1'].shape[1]
    tb = _pick_tb(b, n * c * 4)
    consts = (w1, w2, p['vrd'], b2)
    cost = pl.CostEstimate(
        flops=int(2 * b * n * c + 4 * b * gc * rd),
        transcendentals=int(b * (2 * rd + gc)),
        bytes_accessed=int(2 * b * n * c * 4 + sum(4 * a.size for a in consts)),
    )
    out = pl.pallas_call(
        functools.partial(se1d_kernel, inv_n=1.0 / n),
        out_shape=jax.ShapeDtypeStruct((b, n // g, gc), jnp.float32),
        grid=(b // tb,),
        in_specs=[pl.BlockSpec((tb, n // g, gc), lambda i: (i, 0, 0))]
                 + [_const_spec(a) for a in consts],
        out_specs=pl.BlockSpec((tb, n // g, gc), lambda i: (i, 0, 0)),
        compiler_params=_COMPILER_PARAMS,
        cost_estimate=cost,
    )(xg, *consts)
    return out.reshape(b, n, c)


def shape_aware_se(x, params):
    """ShapeAwareSE.forward: 4D -> 2D SE gate, 3D -> 1D SE gate, anything else -> identity."""
    x = x.astype(jnp.float32)
    if x.ndim == 4:
        return _se_4d(x, params['p2d'])
    if x.ndim == 3:
        return _se_3d(x, params['p1d'])
    return x


# ------------------------------ parameters (torch layouts -> kernel layouts) ------------------------------
def init_params(key, channels, rd_ratio=0.25):
    rd = int(channels * rd_ratio)
    ks = iter(jax.random.split(key, 32))

    def nrm(shape, s=0.3):
        return s * jax.random.normal(next(ks), shape, jnp.float32)

    def bn_fold(c):  # eval-mode BatchNorm -> (scale, shift)
        gamma = 1.0 + 0.1 * jax.random.normal(next(ks), (c,), jnp.float32)
        beta = 0.1 * jax.random.normal(next(ks), (c,), jnp.float32)
        mean = 0.1 * jax.random.normal(next(ks), (c,), jnp.float32)
        var = 1.0 + 0.1 * jax.random.uniform(next(ks), (c,), jnp.float32)
        scale = gamma * jax.lax.rsqrt(var + BN_EPS)
        return scale, beta - mean * scale

    # ---- 2D branch (used for 4D inputs) ----
    w1_2d = nrm((rd, channels, 1, 1))        # conv1_2d.weight
    s1, t1 = bn_fold(rd)                     # bn1_2d
    dw_2d = nrm((rd, 1, 3, 3))               # dw_2d.weight (only center tap sees the 1x1 pooled map)
    s2, t2 = bn_fold(rd)                     # bn2_2d
    w2_2d = nrm((channels, rd, 1, 1))        # conv2_2d.weight
    b2_2d = nrm((channels,))                 # conv2_2d.bias
    p2d = dict(
        w1=w1_2d[:, :, 0, 0].T,                                        # (C, rd)
        w2=w2_2d[:, :, 0, 0].T,                                        # (rd, C)
        vrd=jnp.stack([s1, t1, dw_2d[:, 0, 1, 1], s2, t2], axis=0),    # (5, rd) packed
        b2=b2_2d.reshape(1, channels),                                 # (1, C)
    )

    # ---- 1D branch (used for 3D inputs) ----
    w1_1d = nrm((rd, channels, 1))           # conv1_1d.weight
    u1, v1 = bn_fold(rd)                     # bn1_1d
    dw_1d = nrm((rd, 1, 3))                  # dw_1d.weight
    u2, v2 = bn_fold(rd)                     # bn2_1d
    w2_1d = nrm((channels, rd, 1))           # conv2_1d.weight
    b2_1d = nrm((channels,))                 # conv2_1d.bias
    p1d = dict(
        w1=w1_1d[:, :, 0].T,                                           # (C, rd)
        w2=w2_1d[:, :, 0].T,                                           # (rd, C)
        vrd=jnp.stack([u1, v1, dw_1d[:, 0, 1], u2, v2], axis=0),       # (5, rd) packed
        b2=b2_1d.reshape(1, channels),                                 # (1, C)
    )
    return dict(p2d=p2d, p1d=p1d)


# ------------------------------ pure-JAX reference (torch forward, eval-mode BN) ------------------------------
def _ref_gate(pooled, p):
    a = jnp.dot(pooled, p['w1'], precision=jax.lax.Precision.HIGHEST)
    a = a * p['vrd'][0] + p['vrd'][1]
    a = jax.nn.gelu(a, approximate=False)
    a = a * p['vrd'][2]
    a = a * p['vrd'][3] + p['vrd'][4]
    a = jax.nn.gelu(a, approximate=False)
    y = jnp.dot(a, p['w2'], precision=jax.lax.Precision.HIGHEST) + p['b2']
    return jax.nn.sigmoid(y)


def ref_se_4d(x, p):
    gate = _ref_gate(jnp.mean(x, axis=(2, 3)), p)
    return x * gate[:, :, None, None]


def ref_se_3d(x, p):
    gate = _ref_gate(jnp.mean(x, axis=1), p)
    return x * gate[:, None, :]


if __name__ == "__main__":
    key = jax.random.PRNGKey(0)
    k4, k3, kp = jax.random.split(key, 3)

    CHANNELS = 32            # rd_channels = int(32 * 0.25) = 8
    B, H, W = 2, 8, 16       # 4D input (B, C, H, W); H*W = 128 -> already lane-dense
    N = 128                  # 3D input (B, N, C); C = 32 -> regrouped to (B, 32, 128) lane-dense

    params = init_params(kp, CHANNELS)
    x4 = jax.random.normal(k4, (B, CHANNELS, H, W), jnp.float32)
    x3 = jax.random.normal(k3, (B, N, CHANNELS), jnp.float32)

    out4 = jax.block_until_ready(shape_aware_se(x4, params))   # 4D branch
    out3 = jax.block_until_ready(shape_aware_se(x3, params))   # 3D branch

    assert out4.shape == x4.shape and out4.dtype == jnp.float32
    assert out3.shape == x3.shape and out3.dtype == jnp.float32
    assert bool(jnp.all(jnp.isfinite(out4))) and bool(jnp.all(jnp.isfinite(out3)))

    # correctness vs. exact-math reference; tolerance covers the A&S erf polynomial inside the
    # in-kernel GELU (~1.5e-7 abs) and MXU f32 matmul rounding.
    r4 = ref_se_4d(x4, params['p2d'])
    r3 = ref_se_3d(x3, params['p1d'])
    assert jnp.allclose(out4, r4, rtol=5e-3, atol=1e-5), float(jnp.max(jnp.abs(out4 - r4)))
    assert jnp.allclose(out3, r3, rtol=5e-3, atol=1e-5), float(jnp.max(jnp.abs(out3 - r3)))

    print("KERNEL_OK")
</pallas_src>

<mosaic_0001>
module attributes {stable_mosaic.version = 11 : i64} {
  func.func @se2d_kernel(%arg0: i32, %arg1: memref<1x32x128xf32, #tpu.memory_space<vmem>>, %arg2: memref<32x8xf32, #tpu.memory_space<vmem>>, %arg3: memref<8x32xf32, #tpu.memory_space<vmem>>, %arg4: memref<5x8xf32, #tpu.memory_space<vmem>>, %arg5: memref<1x32xf32, #tpu.memory_space<vmem>>, %arg6: memref<1x32x128xf32, #tpu.memory_space<vmem>>) attributes {dimension_semantics = [#tpu.dimension_semantics<parallel>], iteration_bounds = array<i64: 2>, scalar_prefetch = 0 : i64, scratch_operands = 0 : i64, tpu.core_type = #tpu.core_type<tc>, window_params = [{transform_indices = @transform_0, window_bounds = array<i64: 1, 32, 128>}, {pipeline_mode = #tpu.pipeline_mode<synchronous>, transform_indices = @transform_1, window_bounds = array<i64: 32, 8>}, {pipeline_mode = #tpu.pipeline_mode<synchronous>, transform_indices = @transform_2, window_bounds = array<i64: 8, 32>}, {pipeline_mode = #tpu.pipeline_mode<synchronous>, transform_indices = @transform_3, window_bounds = array<i64: 5, 8>}, {pipeline_mode = #tpu.pipeline_mode<synchronous>, transform_indices = @transform_4, window_bounds = array<i64: 1, 32>}, {transform_indices = @transform_5, window_bounds = array<i64: 1, 32, 128>}]} {
    %c0 = arith.constant 0 : index
    %c0_0 = arith.constant 0 : index
    %c0_1 = arith.constant 0 : index
    %0 = vector.load %arg1[%c0, %c0_0, %c0_1] : memref<1x32x128xf32, #tpu.memory_space<vmem>>, vector<1x32x128xf32>
    %cst = arith.constant dense<0.000000e+00> : vector<1x32xf32>
    %1 = vector.multi_reduction <add>, %0, %cst [2] : vector<1x32x128xf32> to vector<1x32xf32>
    %cst_2 = arith.constant 7.812500e-03 : f32
    %2 = vector.broadcast %cst_2 : f32 to vector<1x32xf32>
    %3 = arith.mulf %1, %2 : vector<1x32xf32>
    %c0_3 = arith.constant 0 : index
    %c0_4 = arith.constant 0 : index
    %4 = vector.load %arg2[%c0_3, %c0_4] : memref<32x8xf32, #tpu.memory_space<vmem>>, vector<32x8xf32>
    %c0_5 = arith.constant 0 : index
    %c0_6 = arith.constant 0 : index
    %5 = vector.load %arg3[%c0_5, %c0_6] : memref<8x32xf32, #tpu.memory_space<vmem>>, vector<8x32xf32>
    %c0_7 = arith.constant 0 : index
    %c0_8 = arith.constant 0 : index
    %6 = vector.load %arg4[%c0_7, %c0_8] : memref<5x8xf32, #tpu.memory_space<vmem>>, vector<5x8xf32>
    %c0_9 = arith.constant 0 : index
    %c0_10 = arith.constant 0 : index
    %7 = vector.load %arg5[%c0_9, %c0_10] : memref<1x32xf32, #tpu.memory_space<vmem>>, vector<1x32xf32>
    %cst_11 = arith.constant dense<0.000000e+00> : vector<1x8xf32>
    %8 = tpu.matmul %3, %4, %cst_11 {dimension_numbers = #tpu.dot_dimension_numbers<[1], [0], [0], [1], [0, 0, 1, 1], [], []>, precision = #tpu.contract_precision<fp32>} : vector<1x32xf32>, vector<32x8xf32>, vector<1x8xf32> -> vector<1x8xf32>
    %9 = vector.extract_strided_slice %6 {offsets = [0, 0], sizes = [1, 8], strides = [1, 1]} : vector<5x8xf32> to vector<1x8xf32>
    %10 = arith.mulf %8, %9 : vector<1x8xf32>
    %11 = vector.extract_strided_slice %6 {offsets = [1, 0], sizes = [1, 8], strides = [1, 1]} : vector<5x8xf32> to vector<1x8xf32>
    %12 = arith.addf %10, %11 : vector<1x8xf32>
    %cst_12 = arith.constant 5.000000e-01 : f32
    %13 = vector.broadcast %cst_12 : f32 to vector<1x8xf32>
    %14 = arith.mulf %13, %12 : vector<1x8xf32>
    %cst_13 = arith.constant 0.707106769 : f32
    %15 = vector.broadcast %cst_13 : f32 to vector<1x8xf32>
    %16 = arith.mulf %12, %15 : vector<1x8xf32>
    %cst_14 = arith.constant 0.000000e+00 : f32
    %17 = vector.broadcast %cst_14 : f32 to vector<1x8xf32>
    %18 = arith.cmpf oge, %16, %17 : vector<1x8xf32>
    %cst_15 = arith.constant 1.000000e+00 : f32
    %cst_16 = arith.constant -1.000000e+00 : f32
    %19 = vector.broadcast %cst_15 : f32 to vector<1x8xf32>
    %20 = vector.broadcast %cst_16 : f32 to vector<1x8xf32>
    %21 = arith.select %18, %19, %20 : vector<1x8xi1>, vector<1x8xf32>
    %22 = math.absf %16 : vector<1x8xf32>
    %cst_17 = arith.constant 0.327591091 : f32
    %23 = vector.broadcast %cst_17 : f32 to vector<1x8xf32>
    %24 = arith.mulf %23, %22 : vector<1x8xf32>
    %cst_18 = arith.constant 1.000000e+00 : f32
    %25 = vector.broadcast %cst_18 : f32 to vector<1x8xf32>
    %26 = arith.addf %25, %24 : vector<1x8xf32>
    %cst_19 = arith.constant 1.000000e+00 : f32
    %27 = vector.broadcast %cst_19 : f32 to vector<1x8xf32>
    %28 = arith.divf %27, %26 : vector<1x8xf32>
    %cst_20 = arith.constant 1.06140542 : f32
    %29 = vector.broadcast %cst_20 : f32 to vector<1x8xf32>
    %30 = arith.mulf %29, %28 : vector<1x8xf32>
    %cst_21 = arith.constant -1.45315206 : f32
    %31 = vector.broadcast %cst_21 : f32 to vector<1x8xf32>
    %32 = arith.addf %30, %31 : vector<1x8xf32>
    %33 = arith.mulf %32, %28 : vector<1x8xf32>
    %cst_22 = arith.constant 1.42141378 : f32
    %34 = vector.broadcast %cst_22 : f32 to vector<1x8xf32>
    %35 = arith.addf %33, %34 : vector<1x8xf32>
    %36 = arith.mulf %35, %28 : vector<1x8xf32>
    %cst_23 = arith.constant -0.284496725 : f32
    %37 = vector.broadcast %cst_23 : f32 to vector<1x8xf32>
    %38 = arith.addf %36, %37 : vector<1x8xf32>
    %39 = arith.mulf %38, %28 : vector<1x8xf32>
    %cst_24 = arith.constant 0.254829586 : f32
    %40 = vector.broadcast %cst_24 : f32 to vector<1x8xf32>
    %41 = arith.addf %39, %40 : vector<1x8xf32>
    %42 = arith.mulf %41, %28 : vector<1x8xf32>
    %cst_25 = arith.constant 0.000000e+00 : f32
    %43 = vector.broadcast %cst_25 : f32 to vector<1x8xf32>
    %44 = arith.subf %43, %22 : vector<1x8xf32>
    %45 = arith.mulf %44, %22 : vector<1x8xf32>
    %46 = math.exp %45 : vector<1x8xf32>
    %47 = arith.mulf %42, %46 : vector<1x8xf32>
    %cst_26 = arith.constant 1.000000e+00 : f32
    %48 = vector.broadcast %cst_26 : f32 to vector<1x8xf32>
    %49 = arith.subf %48, %47 : vector<1x8xf32>
    %50 = arith.mulf %21, %49 : vector<1x8xf32>
    %cst_27 = arith.constant 1.000000e+00 : f32
    %51 = vector.broadcast %cst_27 : f32 to vector<1x8xf32>
    %52 = arith.addf %51, %50 : vector<1x8xf32>
    %53 = arith.mulf %14, %52 : vector<1x8xf32>
    %54 = vector.extract_strided_slice %6 {offsets = [2, 0], sizes = [1, 8], strides = [1, 1]} : vector<5x8xf32> to vector<1x8xf32>
    %55 = arith.mulf %53, %54 : vector<1x8xf32>
    %56 = vector.extract_strided_slice %6 {offsets = [3, 0], sizes = [1, 8], strides = [1, 1]} : vector<5x8xf32> to vector<1x8xf32>
    %57 = arith.mulf %55, %56 : vector<1x8xf32>
    %58 = vector.extract_strided_slice %6 {offsets = [4, 0], sizes = [1, 8], strides = [1, 1]} : vector<5x8xf32> to vector<1x8xf32>
    %59 = arith.addf %57, %58 : vector<1x8xf32>
    %cst_28 = arith.constant 5.000000e-01 : f32
    %60 = vector.broadcast %cst_28 : f32 to vector<1x8xf32>
    %61 = arith.mulf %60, %59 : vector<1x8xf32>
    %cst_29 = arith.constant 0.707106769 : f32
    %62 = vector.broadcast %cst_29 : f32 to vector<1x8xf32>
    %63 = arith.mulf %59, %62 : vector<1x8xf32>
    %cst_30 = arith.constant 0.000000e+00 : f32
    %64 = vector.broadcast %cst_30 : f32 to vector<1x8xf32>
    %65 = arith.cmpf oge, %63, %64 : vector<1x8xf32>
    %cst_31 = arith.constant 1.000000e+00 : f32
    %cst_32 = arith.constant -1.000000e+00 : f32
    %66 = vector.broadcast %cst_31 : f32 to vector<1x8xf32>
    %67 = vector.broadcast %cst_32 : f32 to vector<1x8xf32>
    %68 = arith.select %65, %66, %67 : vector<1x8xi1>, vector<1x8xf32>
    %69 = math.absf %63 : vector<1x8xf32>
    %cst_33 = arith.constant 0.327591091 : f32
    %70 = vector.broadcast %cst_33 : f32 to vector<1x8xf32>
    %71 = arith.mulf %70, %69 : vector<1x8xf32>
    %cst_34 = arith.constant 1.000000e+00 : f32
    %72 = vector.broadcast %cst_34 : f32 to vector<1x8xf32>
    %73 = arith.addf %72, %71 : vector<1x8xf32>
    %cst_35 = arith.constant 1.000000e+00 : f32
    %74 = vector.broadcast %cst_35 : f32 to vector<1x8xf32>
    %75 = arith.divf %74, %73 : vector<1x8xf32>
    %cst_36 = arith.constant 1.06140542 : f32
    %76 = vector.broadcast %cst_36 : f32 to vector<1x8xf32>
    %77 = arith.mulf %76, %75 : vector<1x8xf32>
    %cst_37 = arith.constant -1.45315206 : f32
    %78 = vector.broadcast %cst_37 : f32 to vector<1x8xf32>
    %79 = arith.addf %77, %78 : vector<1x8xf32>
    %80 = arith.mulf %79, %75 : vector<1x8xf32>
    %cst_38 = arith.constant 1.42141378 : f32
    %81 = vector.broadcast %cst_38 : f32 to vector<1x8xf32>
    %82 = arith.addf %80, %81 : vector<1x8xf32>
    %83 = arith.mulf %82, %75 : vector<1x8xf32>
    %cst_39 = arith.constant -0.284496725 : f32
    %84 = vector.broadcast %cst_39 : f32 to vector<1x8xf32>
    %85 = arith.addf %83, %84 : vector<1x8xf32>
    %86 = arith.mulf %85, %75 : vector<1x8xf32>
    %cst_40 = arith.constant 0.254829586 : f32
    %87 = vector.broadcast %cst_40 : f32 to vector<1x8xf32>
    %88 = arith.addf %86, %87 : vector<1x8xf32>
    %89 = arith.mulf %88, %75 : vector<1x8xf32>
    %cst_41 = arith.constant 0.000000e+00 : f32
    %90 = vector.broadcast %cst_41 : f32 to vector<1x8xf32>
    %91 = arith.subf %90, %69 : vector<1x8xf32>
    %92 = arith.mulf %91, %69 : vector<1x8xf32>
    %93 = math.exp %92 : vector<1x8xf32>
    %94 = arith.mulf %89, %93 : vector<1x8xf32>
    %cst_42 = arith.constant 1.000000e+00 : f32
    %95 = vector.broadcast %cst_42 : f32 to vector<1x8xf32>
    %96 = arith.subf %95, %94 : vector<1x8xf32>
    %97 = arith.mulf %68, %96 : vector<1x8xf32>
    %cst_43 = arith.constant 1.000000e+00 : f32
    %98 = vector.broadcast %cst_43 : f32 to vector<1x8xf32>
    %99 = arith.addf %98, %97 : vector<1x8xf32>
    %100 = arith.mulf %61, %99 : vector<1x8xf32>
    %cst_44 = arith.constant dense<0.000000e+00> : vector<1x32xf32>
    %101 = tpu.matmul %100, %5, %cst_44 {dimension_numbers = #tpu.dot_dimension_numbers<[1], [0], [0], [1], [0, 0, 1, 1], [], []>, precision = #tpu.contract_precision<fp32>} : vector<1x8xf32>, vector<8x32xf32>, vector<1x32xf32> -> vector<1x32xf32>
    %102 = arith.addf %101, %7 : vector<1x32xf32>
    %cst_45 = arith.constant 0.000000e+00 : f32
    %103 = vector.broadcast %cst_45 : f32 to vector<1x32xf32>
    %104 = arith.subf %103, %102 : vector<1x32xf32>
    %105 = math.exp %104 : vector<1x32xf32>
    %cst_46 = arith.constant 1.000000e+00 : f32
    %106 = vector.broadcast %cst_46 : f32 to vector<1x32xf32>
    %107 = arith.addf %106, %105 : vector<1x32xf32>
    %cst_47 = arith.constant 1.000000e+00 : f32
    %108 = vector.broadcast %cst_47 : f32 to vector<1x32xf32>
    %109 = arith.divf %108, %107 : vector<1x32xf32>
    %110 = vector.shape_cast %109 : vector<1x32xf32> to vector<1x32x1xf32>
    %111 = vector.broadcast %110 : vector<1x32x1xf32> to vector<1x32x128xf32>
    %112 = arith.mulf %0, %111 : vector<1x32x128xf32>
    %c0_48 = arith.constant 0 : index
    %c0_49 = arith.constant 0 : index
    %c0_50 = arith.constant 0 : index
    %113 = vector.load %arg6[%c0_48, %c0_49, %c0_50] : memref<1x32x128xf32, #tpu.memory_space<vmem>>, vector<1x32x128xf32>
    tpu.vector_store %arg6[%c0_48, %c0_49, %c0_50], %112 {strides = array<i32>} : memref<1x32x128xf32, #tpu.memory_space<vmem>>, vector<1x32x128xf32>,
    return
  }
  func.func @transform_0(%arg0: i32) -> (i32, i32, i32) {
    %c0_i32 = arith.constant 0 : i32
    %c0_i32_0 = arith.constant 0 : i32
    %c0_i32_1 = arith.constant 0 : i32
    return %arg0, %c0_i32, %c0_i32_0 : i32, i32, i32
  }
  func.func @transform_1(%arg0: i32) -> (i32, i32) {
    %c0_i32 = arith.constant 0 : i32
    %c0_i32_0 = arith.constant 0 : i32
    %c0_i32_1 = arith.constant 0 : i32
    return %c0_i32, %c0_i32_0 : i32, i32
  }
  func.func @transform_2(%arg0: i32) -> (i32, i32) {
    %c0_i32 = arith.constant 0 : i32
    %c0_i32_0 = arith.constant 0 : i32
    %c0_i32_1 = arith.constant 0 : i32
    return %c0_i32, %c0_i32_0 : i32, i32
  }
  func.func @transform_3(%arg0: i32) -> (i32, i32) {
    %c0_i32 = arith.constant 0 : i32
    %c0_i32_0 = arith.constant 0 : i32
    %c0_i32_1 = arith.constant 0 : i32
    return %c0_i32, %c0_i32_0 : i32, i32
  }
  func.func @transform_4(%arg0: i32) -> (i32, i32) {
    %c0_i32 = arith.constant 0 : i32
    %c0_i32_0 = arith.constant 0 : i32
    %c0_i32_1 = arith.constant 0 : i32
    return %c0_i32, %c0_i32_0 : i32, i32
  }
  func.func @transform_5(%arg0: i32) -> (i32, i32, i32) {
    %c0_i32 = arith.constant 0 : i32
    %c0_i32_0 = arith.constant 0 : i32
    %c0_i32_1 = arith.constant 0 : i32
    return %arg0, %c0_i32, %c0_i32_0 : i32, i32, i32
  }
}

</mosaic_0001>

<bundles_post_ra>
// kernel: tpu_custom_call.1
= control target key start
LH: loop header
LB: loop body
LE: loop exit
PB: predicated region body
PF: predicated region fallthrough
CT: control target
= control target key end

     0   :  { %10 = vsyncpa [#allocation3], 0  ;;  %s1254_s0 = inlined_call_operand.hbm [shape: f32[2,32,128], index: 0, kind: input, shape index: {}]   ;;  %s1255_s1 = inlined_call_operand.vmem [shape: f32[32,8], index: 1, kind: input, shape index: {}]   ;;  %s1256_s2 = inlined_call_operand.vmem [shape: f32[8,32], index: 2, kind: input, shape index: {}]   ;;  %s1257_s3 = inlined_call_operand.vmem [shape: f32[5,8], index: 3, kind: input, shape index: {}]   ;;  %s1258_s4 = inlined_call_operand.vmem [shape: f32[1,32], index: 4, kind: input, shape index: {}]   ;;  %s1259_s5 = inlined_call_operand.hbm [shape: f32[2,32,128], index: 5, kind: output, shape index: {}]  }
   0x1   :  { %12 = vsyncpa [#allocation3 + $0x1], 0 }
   0x2   :  { %13 = vsyncpa [#allocation4], 0 }
   0x3   :  { %15 = vsyncpa [#allocation4 + $0x1], 0  ;;  %s1077_s18 = smov 0   ;;  %s1079_s19 = smov 0  }
   0x4   :  { %s1081_s20 = smov 0   ;;  %s1083_s21 = smov 0  }
   0x5 LB: > { %s1098_s22 = sadd.s32 4294967295, %s1040_s21   ;;  %s860_s23 = sadd.s32 4294967294, %s1040_s21   ;;  %s1040_s21 = sphi %s1083_s21, %s1269_s21   ;;  %s1036_s20 = sphi %s1081_s20, %s1268_s20   ;;  %s1032_s19 = sphi %s1079_s19, %s1267_s19   ;;  %s1028_s18 = sphi %s1077_s18, %s1266_s18  }
   0x6   : > { %s1102_s24 = sadd.s32 1, %s1040_s21   ;;  %s28_s25 = sadd.s32 1, %s1036_s20 }
   0x7   : > { %s25_s26 = ssub.s32 %s1040_s21, %s1102_s24  ;;  %p35_p0 = scmp.ne.s32.totalorder %s1036_s20, %s1032_s19 }
   0x8   : > { %p26_p1 = scmp.eq.s32.totalorder %s25_s26, 0  ;;  %p36_p2 = scmp.eq.s32.totalorder %s1040_s21, 0 }
   0x9   : > { %p41_p3 = scmp.ne.s32.totalorder %s1032_s19, %s1028_s18  ;;  %p42_p4 = scmp.eq.s32.totalorder %s1098_s22, 0 }
   0xa   : > { %s1114_s27 = scalar_select %p26_p1, %s1036_s20, %s28_s25  }
   0xb   : > { %p1116_p5 = por %p36_p2, %p35_p0  ;;  %p1120_p6 = por %p42_p4, %p41_p3 }
   0xc   : > { %p149_p7 = scmp.eq.s32.totalorder %s1098_s22, 1  ;;  %p155_p8 = scmp.eq.s32.totalorder %s860_s23, 1 }
   0xd   : > { %p888_p10 = scmp.lt.s32.totalorder %s1040_s21, 2  ;;  %s187_s7 = sand.u32 1, %s1036_s20  }
   0xe   : > { %p1127_p11 = por %p149_p7, %p35_p0  ;;  %p1131_p12 = por %p155_p8, %p41_p3 }
   0xf   : > { %s874_s8 = sshll.u32 %s1040_s21, 5  ;;  %s863_s9 = sshll.u32 %s187_s7, 5 }
  0x10   : > { %s196_s12 = scalar_lea.hbm %s1254_s0, %s874_s8  ;;  %s191_s14 = scalar_lea.vmem [#allocation2], %s863_s9 }
  0x11   : > { %s197_s13 = sshll.u32 %s196_s12, 4  ;;  %s199_s15 = sshll.u32 %s191_s14, 4  ;;  %s198_s13 = int_to_ptr.hbm [resolvable:$true] %s197_s13  ;;  %s200_s15 = int_to_ptr.vmem [resolvable:$true] %s199_s15 }
  0x12   : > { %p1142_p13 = pnand %p888_p10, %p1116_p5  ;;  %p866_p0 = scmp.ge.s32.totalorder %s1040_s21, 1 }
  0x13   : > { %p207_p1 = scmp.lt.s32.totalorder %s1040_s21, 3  ;;  %s188_s17 = scalar_lea.sflag [#allocation3], %s187_s7 }
  0x14   : > { %s944_s23 = sshra.s32 %s198_s13, 4  ;;  %p948_p3 = pneg %p1142_p13  ;;  %s945_s23 = int_to_ptr.hbm [resolvable:$true] %s944_s23 }
  0x15   : > { %s946_s25 = scalar_lea.hbm %s945_s23, 32  ;;  %s951_s28 = scalar_lea.hbm %s1254_s0, 64 }
  0x16   : > { %p947_p2 = scmp.ne.s32.totalorder %s945_s23, %s946_s25  ;;  %p952_p5 = scmp.lt.s32.totalorder %s945_s23, %s1254_s0 }
  0x17   : > { %p953_p8 = scmp.lt.s32.totalorder %s951_s28, %s946_s25 }
  0x18   : > { %p949_p4 = pnand %p948_p3, %p947_p2 }
  0x19   : > { %p954_p10 = por %p953_p8, %p952_p5 }
  0x1a   : > { %p950_p7 = pneg %p949_p4 }
  0x1c   : > { %p955_p9 = pnand %p954_p10, %p950_p7 }
  0x1e   : > { %958 = shalt.err (!%p955_p9)
}
  0x1f   : > { %s1042_s7 = smov 128   ;;  %s1043_s11 = smov 8  }
  0x20   : > { %883 = dma.hbm_to_vmem [thread:$0]  (!%p1142_p13), %s198_s13, 512, %s200_s15, %s188_s17, %s1042_s7, %s1042_s7, %s1043_s11  }
  0x21   : > { %p208_p2 = pnand %p866_p0, %p207_p1 }
  0x22   : > { %s1163_s12 = sand.u32 (!%p208_p2), 1, %s1032_s19  }
  0x23   : > { %211 = sbr.rel (%p208_p2) target bundleno = 747 (0x2eb), region = 40  ;;  %s867_s14 = sshll.u32 (!%p208_p2), %s1163_s12, 5 }
  0x24   : > { %s214_s23 = scalar_lea.sflag (!%p208_p2), [#allocation3], %s1163_s12  ;;  %s217_s25 = scalar_lea.vmem (!%p208_p2), [#allocation2], %s867_s14 }
  0x28   : > { %1019 = dma.done.wait (%p1120_p6), %s214_s23, 512  }
  0x29   : > { %1021 = vsyncadd (%p1120_p6), %s214_s23, 4294966784  ;;  %v1173_v0 = vld [vmem:[%s217_s25] sm:$0xff]  ;;  %v1175_v1 = vld [vmem:[%s217_s25 + $0x10] sm:$0xff]  ;;  %v272_v28 = vlaneseq  ;;  %vm277_vm0 = vcmask 130112   ;;  %vm281_vm1 = vcmask 195712   ;;  %vm285_vm2 = vcmask 261312  }
  0x2a   : > { %249 = vadd.xlane.f32.xlu0 %v1173_v0  ;;  %253 = vadd.xlane.f32.xlu1 %v1175_v1  ;;  %v1179_v2 = vld [vmem:[%s217_s25 + $0x8] sm:$0xff]  ;;  %v1181_v3 = vld [vmem:[%s217_s25 + $0x18] sm:$0xff]  ;;  %v263_v6 = vld [vmem:[%s1255_s1 + $0x10] sm:$0xff]  ;;  %vm287_vm3 = vcmask 261120   ;;  %vm569_vm14 = vcmask 64512   ;;  %s244_s13 = scalar_lea.vmem [#allocation5], %s867_s14 }
  0x2b   : > { %v264_v4 = vld [vmem:[%s1255_s1 + $0x18] sm:$0xff]  ;;  %v304_v8 = vand.u32 4294901760, %v263_v6  ;;  %v262_v9 = vld [vmem:[%s1255_s1 + $0x8] sm:$0xff]  ;;  %v261_v13 = vld [vmem:[%s1255_s1] sm:$0xff]  ;;  %v273_v31 = vand.u32 127, %v272_v28  ;;  %s875_s15 = sshll.u32 %s1098_s22, 5 }
  0x2c   : > { %v302_v5 = vand.u32 4294901760, %v264_v4  ;;  %v306_v12 = vand.u32 4294901760, %v262_v9  ;;  %v308_v17 = vand.u32 4294901760, %v261_v13  ;;  %v1201_v61 = vld [vmem:[%s1257_s3] sm:$0x1f]  ;;  %s783_s17 = scalar_lea.hbm %s1259_s5, %s875_s15  ;;  %s784_s26 = sshll.u32 %s244_s13, 4  ;;  %s785_s26 = int_to_ptr.vmem [resolvable:$true] %s784_s26 }
  0x2d   : > { %v338_v11 = vsub.f32 %v263_v6, %v304_v8  ;;  %v275_v33 = vadd.s32 4294967288, %v273_v31  ;;  %v283_v34 = vadd.s32 4294967272, %v273_v31  ;;  %v279_v35 = vadd.s32 4294967280, %v273_v31  ;;  %s786_s8 = sshll.u32 %s783_s17, 4  ;;  %s772_s22 = scalar_lea.sflag [#allocation4], %s1163_s12  ;;  %s787_s8 = int_to_ptr.hbm [resolvable:$true] %s786_s8 }
  0x2e   : > { %v332_v7 = vsub.f32 %v264_v4, %v302_v5  ;;  %403 = vmatpush.msra.mxu3 %v302_v5  ;;  %303 = vmatpush.msra.mxu0 %v302_v5  ;;  %v344_v16 = vsub.f32 %v262_v9, %v306_v12  ;;  %v350_v21 = vsub.f32 %v261_v13, %v308_v17  ;;  %v477_v6 = vrot.slane %v1201_v61, 1  ;;  %s988_s14 = sshra.s32 %s787_s8, 4  ;;  %s994_s7 = scalar_lea.hbm %s1259_s5, 64  ;;  %s989_s14 = int_to_ptr.hbm [resolvable:$true] %s988_s14 }
  0x2f   : > { %v339_v15 = vand.u32 4294901760, %v338_v11  ;;  %s990_s28 = scalar_lea.hbm %s989_s14, 32  ;;  %p995_p0 = scmp.lt.s32.totalorder %s989_s14, %s1259_s5 }
  0x30   : > { %v333_v10 = vand.u32 4294901760, %v332_v7  ;;  %374 = vmatpush.msra.mxu2 %v332_v7  ;;  %405 = vmatpush.msra.mxu3 %v304_v8  ;;  %v345_v20 = vand.u32 4294901760, %v344_v16  ;;  %v351_v24 = vand.u32 4294901760, %v350_v21  ;;  %p991_p6 = scmp.ne.s32.totalorder %s989_s14, %s990_s28  ;;  %p996_p1 = scmp.lt.s32.totalorder %s994_s7, %s990_s28 }
  0x31   : > { %305 = vmatpush.msra.mxu0 %v304_v8  ;;  %v340_v19 = vsub.f32 %v338_v11, %v339_v15 }
  0x32   : > { %251 = vadd.xlane.f32.xlu0 %v1179_v2  ;;  %255 = vadd.xlane.f32.xlu1 %v1181_v3  ;;  %v334_v14 = vsub.f32 %v332_v7, %v333_v10  ;;  %v346_v23 = vsub.f32 %v344_v16, %v345_v20  ;;  %v352_v26 = vsub.f32 %v350_v21, %v351_v24  ;;  %p992_p9 = pnand %p991_p6, %p1127_p11  ;;  %p997_p3 = por %p996_p1, %p995_p0 }
  0x33   : > { %377 = vmatpush.msra.mxu2 %v338_v11  ;;  %407 = vmatpush.msra.mxu3 %v306_v12  ;;  %v341_v22 = vand.u32 4294901760, %v340_v19 }
  0x34   : > { %307 = vmatpush.msra.mxu0 %v306_v12  ;;  %v335_v18 = vand.u32 4294901760, %v334_v14  ;;  %v347_v25 = vand.u32 4294901760, %v346_v23  ;;  %v353_v27 = vand.u32 4294901760, %v352_v26  ;;  %p993_p13 = pneg %p992_p9 }
  0x35   : > { %380 = vmatpush.msra.mxu2 %v344_v16  ;;  %409 = vmatpush.msra.mxu3 %v308_v17 }
  0x36   : > { %309 = vmatpush.msra.mxu0 %v308_v17  ;;  %336 = vmatpush.msra.mxu1 %v335_v18  ;;  %p998_p4 = pnand %p997_p3, %p993_p13 }
  0x37   : > { %383 = vmatpush.msra.mxu2 %v350_v21 }
  0x38   : > { %432 = vmatpush.msrb.mxu0 %v333_v10  ;;  %342 = vmatpush.msra.mxu1 %v341_v22 }
  0x3a   : > { %436 = vmatpush.msrb.mxu0 %v339_v15  ;;  %348 = vmatpush.msra.mxu1 %v347_v25 }
  0x3c   : > { %440 = vmatpush.msrb.mxu0 %v345_v20  ;;  %354 = vmatpush.msra.mxu1 %v353_v27 }
  0x3e   : > { %463 = vmatpush.msrb.mxu1 %v302_v5  ;;  %444 = vmatpush.msrb.mxu0 %v351_v24 }
  0x40   : > { %465 = vmatpush.msrb.mxu1 %v304_v8 }
  0x42   : > { %467 = vmatpush.msrb.mxu1 %v306_v12 }
  0x44   : > { %469 = vmatpush.msrb.mxu1 %v308_v17 }
  0x9d   : > { %v250_v29 = vpop.xlane.xlu0 %249  ;;  %v254_v30 = vpop.xlane.xlu1 %253 }
  0x9e   : > { %v257_v32 = vmul.f32 0.0078125, %v250_v29  ;;  %v259_v36 = vmul.f32 0.0078125, %v254_v30 }
  0xa0   : > { %v274_v41 = vperm.slane %v257_v32, %v273_v31  ;;  %v280_v44 = vperm.slane %v259_v36, %v279_v35 }
  0xa5   : > { %v252_v37 = vpop.xlane.xlu0 %251  ;;  %v256_v38 = vpop.xlane.xlu1 %255 }
  0xa6   : > { %v258_v39 = vmul.f32 0.0078125, %v252_v37  ;;  %v260_v40 = vmul.f32 0.0078125, %v256_v38 }
  0xa8   : > { %v276_v42 = vperm.slane %v258_v39, %v275_v33  ;;  %v284_v43 = vperm.slane %v260_v40, %v283_v34  ;;  %v265_v33 = vld [vmem:[%s1256_s2] sm:$0xff] }
  0xa9   : > { %v588_v34 = vand.u32 4294901760, %v265_v33 }
  0xaa   : > { %v278_v45 = vsel %vm277_vm0, %v276_v42, %v274_v41 }
  0xab   : > { %v282_v46 = vsel %vm281_vm1, %v280_v44, %v278_v45  ;;  %v615_v36 = vsub.f32 %v265_v33, %v588_v34  ;;  %589 = vmatpush.msrb.mxu2 %v588_v34  ;;  %v1044_v45 = vmov -1.0  }
  0xac   : > { %v286_v47 = vsel %vm285_vm2, %v284_v43, %v282_v46 }
  0xad   : > { %v288_v48 = vsel %vm287_vm3, %v286_v47, 0  ;;  %v616_v38 = vand.u32 4294901760, %v615_v36 }
  0xae   : > { %v310_v49 = vand.u32 4294901760, %v288_v48 }
  0xaf   : > { %v617_v41 = vsub.f32 %v615_v36, %v616_v38 }
  0xb0   : > { %356 = vmatmul.f32.vlgmr.msra.gmra.mxu1 %v310_v49  ;;  %v311_v50 = vsub.f32 %v288_v48, %v310_v49 }
  0xb1   : > { %665 = vmatpush.msra.mxu1 %v588_v34  ;;  %v618_v43 = vand.u32 4294901760, %v617_v41 }
  0xb2   : > { %386 = vmatmul.f32.vlgmr.msra.gmra.mxu2 %v311_v50  ;;  %v312_v51 = vand.u32 4294901760, %v311_v50 }
  0xb3   : > { %691 = vmatpush.msra.mxu2 %v616_v38  ;;  %619 = vmatpush.msrb.mxu3 %v618_v43  ;;  %v267_v38 = vld [vmem:[%s1258_s4] sm:$0x1] }
  0xb4   : > { %413 = vmatmul.f32.vlgmr.msra.gmra.mxu3 %v312_v51  ;;  %v313_v52 = vsub.f32 %v311_v50, %v312_v51  ;;  %v520_v50 = vrot.slane %v1201_v61, 2 }
  0xb5   : > { %713 = vmatpush.msra.mxu3 %v588_v34 }
  0xb6   : > { %v314_v53 = vand.u32 4294901760, %v313_v52  ;;  %v523_v52 = vrot.slane %v1201_v61, 3 }
  0xb8   : > { %315 = vmatmul.f32.vlgmr.msra.gmra.mxu0 %v314_v53  ;;  %471 = vmatmul.f32.vlgmr.msrb.gmra.mxu1 %v310_v49 }
  0xb9   : > { %642 = vmatpush.msra.mxu0 %v615_v36 }
  0xc0   : > { %446 = vmatmul.f32.vlgmr.msrb.gmra.mxu0 %v310_v49 }
 0x12d   : > { %v357_v54 = vpop.f32.mrf.mxu1 }
 0x135   : > { %v316_v55 = vpop.f32.mrf.mxu0  ;;  %v387_v57 = vpop.f32.mrf.mxu2 }
 0x136   : > { %v358_v56 = vadd.f32 %v357_v54, %v316_v55  ;;  %v472_v4 = vpop.f32.mrf.mxu1  ;;  %v526_v54 = vrot.slane %v1201_v61, 4 }
 0x137   : > { %v414_v59 = vpop.f32.mrf.mxu3 }
 0x138   : > { %v388_v58 = vadd.f32 %v387_v57, %v358_v56 }
 0x13a   : > { %v415_v60 = vadd.f32 %v414_v59, %v388_v58 }
 0x13d   : > { %v447_v62 = vpop.f32.mrf.mxu0 }
 0x13e   : > { %v448_v63 = vadd.f32 %v447_v62, %v415_v60 }
 0x140   : > { %v473_v5 = vadd.f32 %v472_v4, %v448_v63 }
 0x142   : > { %v475_v7 = vmul.f32 %v473_v5, %v1201_v61 }
 0x144   : > { %v479_v8 = vadd.f32 %v477_v6, %v475_v7 }
 0x146   : > { %v481_v9 = vmul.f32 0.70710677, %v479_v8  ;;  %v480_v48 = vmul.f32 0.5, %v479_v8 }
 0x148   : > { %v484_v10 = vand.u32 2147483647, %v481_v9  ;;  %vm482_vm8 = vcmp.ge.f32.partialorder %v481_v9, 0.0 }
 0x149   : > { %v483_v46 = vsel %vm482_vm8, 1.0, %v1044_v45 }
 0x14a   : > { %v485_v11 = vmul.f32 0.3275911, %v484_v10  ;;  %v511_v23 = vsub.f32 0.0, %v484_v10 }
 0x14c   : > { %v486_v12 = vadd.f32 1.0, %v485_v11  ;;  %v512_v26 = vmul.f32 %v511_v23, %v484_v10 }
 0x14e   : > { %932 = vrcp.f32 %v486_v12  ;;  %v498_v16 = vand.u32 2147483648, %v486_v12  ;;  %v496_v18 = vand.u32 2147483647, %v486_v12  ;;  %vm492_vm5 = vweird.f32 %v486_v12 }
 0x14f   : > { %v513_v30 = vmul.f32 1.442695, %v512_v26 }
 0x150   : > { %v499_v20 = vor.u32 1.1754944e-38, %v498_v16  ;;  %vm497_vm7 = vcmp.eq.f32.partialorder %v496_v18, 8.507059e+37 }
 0x151   : > { %934 = vpow2.f32 %v513_v30 }
 0x154   : > { %v933_v13 = vpop.eup %932 }
 0x155   : > { %v488_v14 = vmul.f32 %v933_v13, %v486_v12  ;;  %vm493_vm4 = vweird.f32 %v933_v13 }
 0x156   : > { %vm494_vm6 = vmor %vm492_vm5, %vm493_vm4 }
 0x157   : > { %v489_v15 = vsub.f32 1.0, %v488_v14  ;;  %v935_v40 = vpop.eup %934 }
 0x159   : > { %v490_v17 = vmul.f32 %v933_v13, %v489_v15 }
 0x15b   : > { %v491_v19 = vadd.f32 %v933_v13, %v490_v17 }
 0x15d   : > { %v495_v21 = vsel %vm494_vm6, %v933_v13, %v491_v19 }
 0x15e   : > { %v500_v22 = vsel %vm497_vm7, %v499_v20, %v495_v21 }
 0x15f   : > { %v502_v24 = vmul.f32 1.0614054, %v500_v22 }
 0x161   : > { %v503_v25 = vadd.f32 -1.4531521, %v502_v24 }
 0x163   : > { %v504_v27 = vmul.f32 %v503_v25, %v500_v22 }
 0x165   : > { %v505_v29 = vadd.f32 1.4214138, %v504_v27 }
 0x167   : > { %v506_v31 = vmul.f32 %v505_v29, %v500_v22 }
 0x169   : > { %v507_v32 = vadd.f32 -0.28449672, %v506_v31 }
 0x16b   : > { %v508_v35 = vmul.f32 %v507_v32, %v500_v22 }
 0x16d   : > { %v509_v37 = vadd.f32 0.2548296, %v508_v35 }
 0x16f   : > { %v510_v39 = vmul.f32 %v509_v37, %v500_v22 }
 0x171   : > { %v515_v42 = vmul.f32 %v935_v40, %v510_v39 }
 0x173   : > { %v516_v44 = vsub.f32 1.0, %v515_v42  ;;  %v740_v42 = vshrl.u32 %v272_v28, 7 }
 0x175   : > { %v517_v47 = vmul.f32 %v516_v44, %v483_v46  ;;  %927 = vset.pattern.permute.xlu2 %v740_v42  ;;  %v759_v44 = vadd.s32 24, %v740_v42 }
 0x177   : > { %v518_v49 = vadd.f32 1.0, %v517_v47  ;;  %930 = vset.pattern.permute.xlu1 %v759_v44 }
 0x179   : > { %v519_v51 = vmul.f32 %v518_v49, %v480_v48 }
 0x17b   : > { %v522_v53 = vmul.f32 %v520_v50, %v519_v51 }
 0x17d   : > { %v525_v55 = vmul.f32 %v523_v52, %v522_v53 }
 0x17f   : > { %v528_v56 = vadd.f32 %v526_v54, %v525_v55 }
 0x181   : > { %v530_v57 = vmul.f32 0.70710677, %v528_v56  ;;  %v529_v29 = vmul.f32 0.5, %v528_v56 }
 0x183   : > { %v533_v58 = vand.u32 2147483647, %v530_v57  ;;  %vm531_vm13 = vcmp.ge.f32.partialorder %v530_v57, 0.0 }
 0x184   : > { %v532_v26 = vsel %vm531_vm13, 1.0, %v1044_v45  ;;  %v753_v45 = vadd.s32 16, %v740_v42 }
 0x185   : > { %v534_v59 = vmul.f32 0.3275911, %v533_v58  ;;  %v560_v61 = vsub.f32 0.0, %v533_v58 }
 0x186   : > { %929 = vset.pattern.permute.xlu0 %v753_v45 }
 0x187   : > { %v535_v60 = vadd.f32 1.0, %v534_v59  ;;  %v561_v14 = vmul.f32 %v560_v61, %v533_v58 }
 0x189   : > { %936 = vrcp.f32 %v535_v60  ;;  %v547_v5 = vand.u32 2147483648, %v535_v60  ;;  %v545_v7 = vand.u32 2147483647, %v535_v60  ;;  %vm541_vm10 = vweird.f32 %v535_v60 }
 0x18a   : > { %v562_v17 = vmul.f32 1.442695, %v561_v14 }
 0x18b   : > { %v548_v9 = vor.u32 1.1754944e-38, %v547_v5  ;;  %vm546_vm12 = vcmp.eq.f32.partialorder %v545_v7, 8.507059e+37 }
 0x18c   : > { %938 = vpow2.f32 %v562_v17 }
 0x18f   : > { %v937_v62 = vpop.eup %936 }
 0x190   : > { %v537_v63 = vmul.f32 %v937_v62, %v535_v60  ;;  %vm542_vm9 = vweird.f32 %v937_v62 }
 0x191   : > { %vm543_vm11 = vmor %vm541_vm10, %vm542_vm9 }
 0x192   : > { %v538_v4 = vsub.f32 1.0, %v537_v63  ;;  %v939_v23 = vpop.eup %938 }
 0x194   : > { %v539_v6 = vmul.f32 %v937_v62, %v538_v4 }
 0x196   : > { %v540_v8 = vadd.f32 %v937_v62, %v539_v6 }
 0x198   : > { %v544_v10 = vsel %vm543_vm11, %v937_v62, %v540_v8 }
 0x199   : > { %v549_v11 = vsel %vm546_vm12, %v548_v9, %v544_v10  ;;  %v747_v9 = vadd.s32 8, %v740_v42 }
 0x19a   : > { %v551_v12 = vmul.f32 1.0614054, %v549_v11 }
 0x19c   : > { %v552_v13 = vadd.f32 -1.4531521, %v551_v12 }
 0x19e   : > { %v553_v15 = vmul.f32 %v552_v13, %v549_v11 }
 0x1a0   : > { %v554_v16 = vadd.f32 1.4214138, %v553_v15 }
 0x1a2   : > { %v555_v18 = vmul.f32 %v554_v16, %v549_v11 }
 0x1a4   : > { %v556_v19 = vadd.f32 -0.28449672, %v555_v18 }
 0x1a6   : > { %v557_v20 = vmul.f32 %v556_v19, %v549_v11 }
 0x1a8   : > { %v558_v21 = vadd.f32 0.2548296, %v557_v20 }
 0x1aa   : > { %v559_v22 = vmul.f32 %v558_v21, %v549_v11 }
 0x1ac   : > { %v564_v24 = vmul.f32 %v939_v23, %v559_v22 }
 0x1ae   : > { %v565_v25 = vsub.f32 1.0, %v564_v24 }
 0x1b0   : > { %v566_v27 = vmul.f32 %v565_v25, %v532_v26 }
 0x1b2   : > { %v567_v30 = vadd.f32 1.0, %v566_v27 }
 0x1b4   : > { %v568_v31 = vmul.f32 %v567_v30, %v529_v29 }
 0x1b6   : > { %v571_v32 = vsel %vm569_vm14, %v568_v31, 0 }
 0x1b7   : > { %v590_v33 = vand.u32 4294901760, %v571_v32 }
 0x1b9   : > { %621 = vmatmul.f32.vlgmr.msrb.gmra.mxu3 %v590_v33  ;;  %v591_v34 = vsub.f32 %v571_v32, %v590_v33 }
 0x1bb   : > { %645 = vmatmul.f32.vlgmr.msra.gmra.mxu0 %v591_v34  ;;  %v592_v35 = vand.u32 4294901760, %v591_v34 }
 0x1bd   : > { %669 = vmatmul.f32.vlgmr.msra.gmra.mxu1 %v592_v35  ;;  %v593_v36 = vsub.f32 %v591_v34, %v592_v35 }
 0x1bf   : > { %v594_v37 = vand.u32 4294901760, %v593_v36 }
 0x1c1   : > { %595 = vmatmul.f32.vlgmr.msrb.gmra.mxu2 %v594_v37  ;;  %715 = vmatmul.f32.vlgmr.msra.gmra.mxu3 %v590_v33 }
 0x1c9   : > { %693 = vmatmul.f32.vlgmr.msra.gmra.mxu2 %v590_v33 }
 0x238   : > { %v646_v46 = vpop.f32.mrf.mxu0 }
 0x23a   : > { %v670_v48 = vpop.f32.mrf.mxu1 }
 0x23c   : > { %v622_v39 = vpop.f32.mrf.mxu3 }
 0x244   : > { %v596_v40 = vpop.f32.mrf.mxu2  ;;  %v716_v52 = vpop.f32.mrf.mxu3 }
 0x245   : > { %v597_v41 = vadd.f32 %v596_v40, %v267_v38 }
 0x247   : > { %v623_v43 = vadd.f32 %v622_v39, %v597_v41 }
 0x249   : > { %v647_v47 = vadd.f32 %v646_v46, %v623_v43 }
 0x24b   : > { %v671_v49 = vadd.f32 %v670_v48, %v647_v47 }
 0x24c   : > { %v694_v50 = vpop.f32.mrf.mxu2 }
 0x24d   : > { %v695_v51 = vadd.f32 %v694_v50, %v671_v49 }
 0x24f   : > { %v717_v53 = vadd.f32 %v716_v52, %v695_v51 }
 0x251   : > { %v719_v54 = vsub.f32 0.0, %v717_v53 }
 0x253   : > { %v720_v55 = vmul.f32 1.442695, %v719_v54 }
 0x255   : > { %940 = vpow2.f32 %v720_v55 }
 0x25b   : > { %v941_v56 = vpop.eup %940 }
 0x25c   : > { %v722_v57 = vadd.f32 1.0, %v941_v56 }
 0x25e   : > { %942 = vrcp.f32 %v722_v57  ;;  %v734_v60 = vand.u32 2147483648, %v722_v57  ;;  %v732_v63 = vand.u32 2147483647, %v722_v57  ;;  %vm728_vm0 = vweird.f32 %v722_v57 }
 0x260   : > { %v735_v5 = vor.u32 1.1754944e-38, %v734_v60  ;;  %vm733_vm2 = vcmp.eq.f32.partialorder %v732_v63, 8.507059e+37 }
 0x264   : > { %v943_v28 = vpop.eup %942 }
 0x265   : > { %v724_v58 = vmul.f32 %v943_v28, %v722_v57  ;;  %vm729_vm15 = vweird.f32 %v943_v28 }
 0x266   : > { %vm730_vm1 = vmor %vm728_vm0, %vm729_vm15 }
 0x267   : > { %v725_v59 = vsub.f32 1.0, %v724_v58 }
 0x269   : > { %v726_v62 = vmul.f32 %v943_v28, %v725_v59 }
 0x26b   : > { %v727_v4 = vadd.f32 %v943_v28, %v726_v62 }
 0x26d   : > { %v731_v6 = vsel %vm730_vm1, %v943_v28, %v727_v4 }
 0x26e   : > { %v736_v7 = vsel %vm733_vm2, %v735_v5, %v731_v6 }
 0x26f   : > { %v738_v8 = vperm.slane %v736_v7, 0 }
 0x271   : > { %761 = vperm.xlu1 %930, %v738_v8   ;;  %755 = vperm.xlu0 %929, %v738_v8  }
 0x272   : > { %743 = vperm.xlu2 %927, %v738_v8  }
 0x279   : > { %931 = vset.pattern.permute.xlu0 %v759_v44 }
 0x27a   : > { %928 = vset.pattern.permute.xlu2 %v747_v9 }
 0x282   : > { %749 = vperm.xlu2 %928, %v738_v8  }
 0x2cc   : > { %v744_v10 = vpop.permute.xlu2 %743 }
 0x2cd   : > { %v763_v61 = vmul.f32 %v744_v10, %v1173_v0 }
 0x2cf   : > { %767 = vst [vmem:[%s244_s13] sm:$0xff] %v763_v61 }
 0x2dc   : > { %v750_v11 = vpop.permute.xlu2 %749 }
 0x2dd   : > { %v764_v12 = vmul.f32 %v750_v11, %v1179_v2 }
 0x2df   : > { %768 = vst [vmem:[%s244_s13 + $0x8] sm:$0xff] %v764_v12 }
 0x2e3   : > { %v762_v13 = vpop.permute.xlu1 %761  ;;  %v756_v14 = vpop.permute.xlu0 %755 }
 0x2e4   : > { %v766_v0 = vmul.f32 %v762_v13, %v1181_v3  ;;  %v765_v15 = vmul.f32 %v756_v14, %v1175_v1 }
 0x2e6   : > { %770 = vst [vmem:[%s244_s13 + $0x18] sm:$0xff] %v766_v0 }
 0x2e7   : > { %769 = vst [vmem:[%s244_s13 + $0x10] sm:$0xff] %v765_v15 }
 0x2e8   : > { %1001 = shalt.err (!%p998_p4)
}
 0x2e9   : > { %s1045_s12 = smov 128   ;;  %s1046_s25 = smov 8  }
 0x2ea   : > { %878 = dma.vmem_to_hbm [thread:$0]  (%p1127_p11), %s785_s26, 512, %s787_s8, %s772_s22, %s1045_s12, %s1045_s12, %s1046_s25  }
 0x2eb PF: > { %s801_s13 = sand.u32 1, %s1028_s18   ;;  %p1265_p7 = scmp.ge.s32.totalorder %s1040_s21, 2 }
 0x2ec   : > { %s802_s15 = scalar_lea.sflag [#allocation4], %s801_s13 }
 0x2ed   : > { %p885_p5 = pnand %p1265_p7, %p1131_p12 }
 0x2ef   : > { %p886_p8 = pneg %p885_p5 }
 0x2f1   : > { %1023 = dma.done.wait (%p886_p8), %s802_s15, 512  }
 0x2f2   : > { %1025 = vsyncadd (%p886_p8), %s802_s15, 4294966784  ;;  %p18_p10 = scmp.ge.s32.totalorder %s1102_s24, 4   ;;  %s1266_s18 = smov %s1032_s19 }
 0x2f3   : > { %s1267_s19 = smov %s1036_s20  ;;  %s1268_s20 = smov %s1114_s27 }
 0x2f4   : > { %s1269_s21 = smov %s1102_s24  ;;  %20 = sbr.rel (!%p18_p10) target bundleno = 5 (0x5), region = 85 }
 0x2f9   :  { %808 = vsyncpa [#allocation3], 1 }
 0x2fa   :  { %810 = vsyncpa [#allocation3 + $0x1], 1 }
 0x2fb   :  { %811 = vsyncpa [#allocation4], 1 }
 0x2fc   :  { %813 = vsyncpa [#allocation4 + $0x1], 1 }

</bundles_post_ra>
